<compile_context>
chip_gen: v5e
topology: v5e:2x2
jax: 0.10.0
libtpu: 0.0.40
codegen_flags: <defaults>
</compile_context>

<pallas_src>
import functools

import jax
import jax.numpy as jnp
from jax import lax
from jax.experimental import pallas as pl
from jax.experimental.pallas import tpu as pltpu


# --------------------------------------------------------------------------- #
# Kernel bodies
# --------------------------------------------------------------------------- #
def _attention_body(q_ref, k_ref, v_ref, mask_ref, out_ref, attn_ref, *,
                    scale, mxu_dtype):
    # q_ref: (TQ, D), k_ref: (Sk, D), v_ref: (Sk, D), mask_ref: (TQ, Sk)
    q = q_ref[...]
    k = k_ref[...]
    v = v_ref[...]
    m = mask_ref[...]
    if m.dtype != jnp.bool_:
        m = m != 0

    # Fold 1/sqrt(d_k) into the small [TQ, D] Q tile (not the [TQ, Sk] scores).
    q_op = (q.astype(jnp.float32) * jnp.float32(scale)).astype(mxu_dtype)
    k_op = k.astype(mxu_dtype)

    # attn_score = q @ k^T : contract on D directly, no explicit K transpose.
    scores = lax.dot_general(
        q_op, k_op,
        dimension_numbers=(((1,), (1,)), ((), ())),
        preferred_element_type=jnp.float32)

    # masked_fill_(attn_mask, -1e9)
    scores = jnp.where(m, jnp.float32(-1e9), scores)

    # numerically stable softmax along the (full) key axis
    row_max = jnp.max(scores, axis=-1, keepdims=True)
    e = jnp.exp(scores - row_max)
    denom = jnp.sum(e, axis=-1, keepdims=True)
    inv = pl.reciprocal(denom, approx=False)   # exact; keeps torch parity
    weights = e * inv

    # Single low-precision cast of the [TQ, Sk] slab, reused for both consumers.
    w_lo = weights.astype(mxu_dtype)

    # output = attn_weights @ v  (f32 accumulation)
    out = jnp.dot(w_lo, v.astype(mxu_dtype), preferred_element_type=jnp.float32)
    out_ref[...] = out.astype(out_ref.dtype)

    if attn_ref is not None:
        if attn_ref.dtype == mxu_dtype:
            attn_ref[...] = w_lo
        elif attn_ref.dtype == jnp.float32:
            attn_ref[...] = weights
        else:
            attn_ref[...] = weights.astype(attn_ref.dtype)


def _sdpa_kernel(q_ref, k_ref, v_ref, mask_ref, out_ref, attn_ref, *,
                 scale, mxu_dtype):
    _attention_body(q_ref, k_ref, v_ref, mask_ref, out_ref, attn_ref,
                    scale=scale, mxu_dtype=mxu_dtype)


def _sdpa_kernel_noweights(q_ref, k_ref, v_ref, mask_ref, out_ref, *,
                           scale, mxu_dtype):
    _attention_body(q_ref, k_ref, v_ref, mask_ref, out_ref, None,
                    scale=scale, mxu_dtype=mxu_dtype)


# --------------------------------------------------------------------------- #
# Tile / VMEM budgeting (generation aware)
# --------------------------------------------------------------------------- #
def _round_up(x, m):
    return ((x + m - 1) // m) * m


def _select_tile_and_vmem(Sq, Sk, D, in_dtype, out_dtype, attn_dtype,
                          mxu_dtype, return_weights, q_tile):
    try:
        info = pltpu.get_tpu_info()
        vmem_cap = int(getattr(info, "vmem_capacity_bytes", 64 << 20))
    except Exception:  # pragma: no cover - CPU interpret / unknown backend
        vmem_cap = 64 << 20
    budget = int(0.72 * vmem_cap)

    in_sz = jnp.dtype(in_dtype).itemsize
    out_sz = jnp.dtype(out_dtype).itemsize
    attn_sz = jnp.dtype(attn_dtype).itemsize if return_weights else 0
    mxu_sz = jnp.dtype(mxu_dtype).itemsize

    def working_set(tq):
        # double-buffered pipeline blocks (q, k, v, mask, out [, attn])
        ws = 2 * (tq * D * in_sz            # q tile
                  + 2 * Sk * D * in_sz      # k, v (resident across i)
                  + tq * Sk * 1             # bool/int8 mask tile
                  + tq * D * out_sz)        # out tile
        if return_weights:
            ws += 2 * tq * Sk * attn_sz     # attn tile
        # f32 intermediates materialized in VMEM: scores, exp, weights
        ws += 3 * tq * Sk * 4
        # low-precision casts: weights (always) + k/v (if MXU dtype differs)
        ws += tq * Sk * mxu_sz
        if mxu_sz != in_sz:
            ws += 2 * Sk * D * mxu_sz
        return ws

    # desired tile: 256 on 128 MiB parts (v5e/v6e), 128 on 64 MiB parts (v7x)
    desired = q_tile if q_tile is not None else (256 if vmem_cap >= (100 << 20) else 128)
    cap = _round_up(Sq, 8)                  # never exceed (padded) Sq
    tq = _round_up(min(desired, cap), 8)
    floor = min(32, cap)
    while tq > floor and working_set(tq) > budget:
        tq = max(floor, _round_up(tq // 2, 8))

    vmem_limit = min(int(0.9 * vmem_cap),
                     max(32 << 20, working_set(tq) + (4 << 20)))
    return tq, int(vmem_limit)


# --------------------------------------------------------------------------- #
# Public wrapper
# --------------------------------------------------------------------------- #
def scaled_dot_product_attention(q, k, v, attn_mask, *, q_tile=None,
                                 exact=False, attn_dtype=None,
                                 return_weights=True):
    """q,k,v: [B,H,S,D]; attn_mask: [B,H,S,S] bool/int (True = masked).

    exact=False (default): bf16 MXU operands / f32 accumulation, bf16 attention
                           weights (fast path for v5e/v6e/v7x).
    exact=True:            f32 MXU operands + f32 weights (torch parity).
    return_weights=False:  skip the [B,H,S,S] weights writeback entirely
                           (largest HBM stream); returns (output, None).
    """
    B, H, Sq, D = q.shape
    Sk = k.shape[2]
    assert k.shape == (B, H, Sk, D) and v.shape == (B, H, Sk, D)
    assert attn_mask.shape == (B, H, Sq, Sk)

    mxu_dtype = jnp.float32 if exact else jnp.bfloat16
    if attn_dtype is None:
        attn_dtype = jnp.float32 if exact else jnp.bfloat16
    out_dtype = q.dtype

    # Mask is streamed as-is (bool is already 1 byte).  Wider masks get a single
    # upstream conversion; callers should pass bool/int8 to avoid that pass.
    if attn_mask.dtype != jnp.bool_ and jnp.dtype(attn_mask.dtype).itemsize > 1:
        # TODO(synk): require bool/int8 masks upstream to drop this extra HBM pass.
        attn_mask = attn_mask.astype(jnp.bool_)

    scale = 1.0 / float(D) ** 0.5

    TQ, vmem_limit = _select_tile_and_vmem(
        Sq, Sk, D, q.dtype, out_dtype, attn_dtype, mxu_dtype,
        return_weights, q_tile)

    # Pad Sq to a multiple of TQ (never fall back to a full-Sq block).
    Sq_pad = _round_up(Sq, TQ)
    if Sq_pad != Sq:
        pad = Sq_pad - Sq
        q = jnp.pad(q, ((0, 0), (0, 0), (0, pad), (0, 0)))
        attn_mask = jnp.pad(attn_mask, ((0, 0), (0, 0), (0, pad), (0, 0)))
    n_q = Sq_pad // TQ

    in_sz = jnp.dtype(q.dtype).itemsize
    out_sz = jnp.dtype(out_dtype).itemsize
    attn_sz = jnp.dtype(attn_dtype).itemsize
    mask_sz = jnp.dtype(attn_mask.dtype).itemsize
    bytes_accessed = int(
        q.size * in_sz + k.size * in_sz + v.size * in_sz
        + attn_mask.size * mask_sz
        + B * H * Sq_pad * D * out_sz
        + (B * H * Sq_pad * Sk * attn_sz if return_weights else 0))
    cost = pl.CostEstimate(
        flops=int(4 * B * H * Sq_pad * Sk * D),
        transcendentals=int(B * H * Sq_pad * Sk),
        bytes_accessed=bytes_accessed)

    sq = pl.Squeezed()
    in_specs = [
        pl.BlockSpec((sq, sq, TQ, D), lambda b, h, i: (b, h, i, 0)),
        pl.BlockSpec((sq, sq, Sk, D), lambda b, h, i: (b, h, 0, 0)),
        pl.BlockSpec((sq, sq, Sk, D), lambda b, h, i: (b, h, 0, 0)),
        pl.BlockSpec((sq, sq, TQ, Sk), lambda b, h, i: (b, h, i, 0)),
    ]
    out_spec_o = pl.BlockSpec((sq, sq, TQ, D), lambda b, h, i: (b, h, i, 0))
    out_spec_a = pl.BlockSpec((sq, sq, TQ, Sk), lambda b, h, i: (b, h, i, 0))

    # i ("arbitrary") stays innermost and un-split so the constant K/V index_map
    # keeps K/V VMEM-resident across query tiles (no re-DMA, no megacore dup).
    compiler_params = pltpu.CompilerParams(
        dimension_semantics=("parallel", "parallel", "arbitrary"),
        vmem_limit_bytes=int(vmem_limit),
    )

    if return_weights:
        kernel = functools.partial(_sdpa_kernel, scale=scale, mxu_dtype=mxu_dtype)
        out, attn = pl.pallas_call(
            kernel,
            out_shape=(
                jax.ShapeDtypeStruct((B, H, Sq_pad, D), out_dtype),
                jax.ShapeDtypeStruct((B, H, Sq_pad, Sk), attn_dtype),
            ),
            grid=(B, H, n_q),
            in_specs=in_specs,
            out_specs=(out_spec_o, out_spec_a),
            compiler_params=compiler_params,
            cost_estimate=cost,
        )(q, k, v, attn_mask)
        if Sq_pad != Sq:
            out = out[:, :, :Sq, :]
            attn = attn[:, :, :Sq, :]
        return out, attn

    # No-weights fast path: the S^2 writeback disappears entirely.
    # TODO(synk): for Sk too large for VMEM-resident K/V, add an Sk-tiled
    #             online-softmax (flash) variant of this path.
    kernel = functools.partial(_sdpa_kernel_noweights, scale=scale,
                               mxu_dtype=mxu_dtype)
    out = pl.pallas_call(
        kernel,
        out_shape=jax.ShapeDtypeStruct((B, H, Sq_pad, D), out_dtype),
        grid=(B, H, n_q),
        in_specs=in_specs,
        out_specs=out_spec_o,
        compiler_params=compiler_params,
        cost_estimate=cost,
    )(q, k, v, attn_mask)
    if Sq_pad != Sq:
        out = out[:, :, :Sq, :]
    return out, None


# --------------------------------------------------------------------------- #
# Reference + tests
# --------------------------------------------------------------------------- #
def _reference(q, k, v, attn_mask, d_k):
    scores = jnp.einsum("bhqd,bhkd->bhqk", q, k) / jnp.sqrt(jnp.float32(d_k))
    scores = jnp.where(attn_mask, -1e9, scores)
    weights = jax.nn.softmax(scores, axis=-1)
    out = jnp.einsum("bhqk,bhkd->bhqd", weights, v)
    return out, weights


def _make_inputs(key, B, H, S, D):
    kq, kk, kv, km = jax.random.split(key, 4)
    q = jax.random.normal(kq, (B, H, S, D), dtype=jnp.float32)
    k = jax.random.normal(kk, (B, H, S, D), dtype=jnp.float32)
    v = jax.random.normal(kv, (B, H, S, D), dtype=jnp.float32)
    attn_mask = jax.random.bernoulli(km, p=0.25, shape=(B, H, S, S))
    # ensure no row is fully masked (would make softmax degenerate)
    attn_mask = attn_mask.at[:, :, :, 0].set(False)
    return q, k, v, attn_mask


if __name__ == "__main__":
    key = jax.random.PRNGKey(0)
    k0, k1 = jax.random.split(key)

    # --- small shape ----------------------------------------------------------
    B, H, S, D = 2, 2, 8, 32
    q, k, v, attn_mask = _make_inputs(k0, B, H, S, D)
    ref_out, ref_w = _reference(q, k, v, attn_mask, D)

    # exact f32 path (torch parity)
    out, weights = scaled_dot_product_attention(q, k, v, attn_mask, exact=True)
    out, weights = jax.block_until_ready((out, weights))
    assert jnp.allclose(out, ref_out, atol=1e-4, rtol=1e-4)
    assert jnp.allclose(weights, ref_w, atol=2e-5, rtol=1e-4)

    # default fast path (bf16 MXU operands, bf16 weights, f32 accumulation)
    out_f, w_f = scaled_dot_product_attention(q, k, v, attn_mask)
    out_f, w_f = jax.block_until_ready((out_f, w_f))
    assert jnp.allclose(out_f.astype(jnp.float32), ref_out, atol=5e-2, rtol=5e-2)
    assert jnp.allclose(w_f.astype(jnp.float32), ref_w, atol=2e-2, rtol=5e-2)

    # --- larger sequence: exercises the query-tiling path ---------------------
    B2, H2, S2, D2 = 1, 2, 256, 32
    q2, k2, v2, m2 = _make_inputs(k1, B2, H2, S2, D2)
    ref_out2, ref_w2 = _reference(q2, k2, v2, m2, D2)

    out2, w2 = scaled_dot_product_attention(q2, k2, v2, m2, q_tile=128, exact=True)
    out2, w2 = jax.block_until_ready((out2, w2))
    assert jnp.allclose(out2, ref_out2, atol=1e-3, rtol=1e-3)
    assert jnp.allclose(w2, ref_w2, atol=1e-4, rtol=1e-3)

    # no-weights fast path (skips the largest HBM stream entirely)
    out_nw, w_nw = scaled_dot_product_attention(
        q2, k2, v2, m2, q_tile=128, return_weights=False)
    out_nw = jax.block_until_ready(out_nw)
    assert w_nw is None
    assert jnp.allclose(out_nw.astype(jnp.float32), ref_out2, atol=5e-2, rtol=5e-2)

    print("KERNEL_OK")
</pallas_src>

<mosaic_0001>
module attributes {stable_mosaic.version = 11 : i64} {
  func.func @_sdpa_kernel(%arg0: i32, %arg1: i32, %arg2: i32, %arg3: memref<1x1x8x32xf32, #tpu.memory_space<vmem>>, %arg4: memref<1x1x8x32xf32, #tpu.memory_space<vmem>>, %arg5: memref<1x1x8x32xf32, #tpu.memory_space<vmem>>, %arg6: memref<1x1x8x8xi32, #tpu.memory_space<vmem>>, %arg7: memref<1x1x8x32xf32, #tpu.memory_space<vmem>>, %arg8: memref<1x1x8x8xf32, #tpu.memory_space<vmem>>) attributes {dimension_semantics = [#tpu.dimension_semantics<parallel>, #tpu.dimension_semantics<parallel>, #tpu.dimension_semantics<arbitrary>], iteration_bounds = array<i64: 2, 2, 1>, scalar_prefetch = 0 : i64, scratch_operands = 0 : i64, tpu.core_type = #tpu.core_type<tc>, window_params = [{transform_indices = @transform_0, window_bounds = array<i64: 1, 1, 8, 32>}, {transform_indices = @transform_1, window_bounds = array<i64: 1, 1, 8, 32>}, {transform_indices = @transform_2, window_bounds = array<i64: 1, 1, 8, 32>}, {transform_indices = @transform_3, window_bounds = array<i64: 1, 1, 8, 8>}, {transform_indices = @transform_4, window_bounds = array<i64: 1, 1, 8, 32>}, {transform_indices = @transform_5, window_bounds = array<i64: 1, 1, 8, 8>}]} {
    %c0 = arith.constant 0 : index
    %c0_0 = arith.constant 0 : index
    %c0_1 = arith.constant 0 : index
    %c0_2 = arith.constant 0 : index
    %0 = vector.load %arg3[%c0, %c0_0, %c0_1, %c0_2] : memref<1x1x8x32xf32, #tpu.memory_space<vmem>>, vector<1x1x8x32xf32>
    %1 = vector.shape_cast %0 : vector<1x1x8x32xf32> to vector<8x32xf32>
    %c0_3 = arith.constant 0 : index
    %c0_4 = arith.constant 0 : index
    %c0_5 = arith.constant 0 : index
    %c0_6 = arith.constant 0 : index
    %2 = vector.load %arg4[%c0_3, %c0_4, %c0_5, %c0_6] : memref<1x1x8x32xf32, #tpu.memory_space<vmem>>, vector<1x1x8x32xf32>
    %3 = vector.shape_cast %2 : vector<1x1x8x32xf32> to vector<8x32xf32>
    %c0_7 = arith.constant 0 : index
    %c0_8 = arith.constant 0 : index
    %c0_9 = arith.constant 0 : index
    %c0_10 = arith.constant 0 : index
    %4 = vector.load %arg5[%c0_7, %c0_8, %c0_9, %c0_10] : memref<1x1x8x32xf32, #tpu.memory_space<vmem>>, vector<1x1x8x32xf32>
    %5 = vector.shape_cast %4 : vector<1x1x8x32xf32> to vector<8x32xf32>
    %c0_11 = arith.constant 0 : index
    %c0_12 = arith.constant 0 : index
    %c0_13 = arith.constant 0 : index
    %c0_14 = arith.constant 0 : index
    %6 = vector.load %arg6[%c0_11, %c0_12, %c0_13, %c0_14] : memref<1x1x8x8xi32, #tpu.memory_space<vmem>>, vector<1x1x8x8xi32>
    %7 = vector.shape_cast %6 : vector<1x1x8x8xi32> to vector<8x8xi32>
    %cst = arith.constant dense<0> : vector<8x8xi32>
    %8 = arith.cmpi ne, %7, %cst : vector<8x8xi32>
    %cst_15 = arith.constant 0.176776692 : f32
    %9 = vector.broadcast %cst_15 : f32 to vector<8x32xf32>
    %10 = arith.mulf %1, %9 : vector<8x32xf32>
    %cst_16 = arith.constant dense<0.000000e+00> : vector<8x8xf32>
    %11 = tpu.matmul %10, %3, %cst_16 {dimension_numbers = #tpu.dot_dimension_numbers<[1], [1], [0], [0], [0, 0, 1, 0], [], []>} : vector<8x32xf32>, vector<8x32xf32>, vector<8x8xf32> -> vector<8x8xf32>
    %cst_17 = arith.constant -1.000000e+09 : f32
    %12 = vector.broadcast %cst_17 : f32 to vector<8x8xf32>
    %13 = arith.select %8, %12, %11 : vector<8x8xi1>, vector<8x8xf32>
    %cst_18 = arith.constant dense<0xFF800000> : vector<8xf32>
    %14 = vector.multi_reduction <maximumf>, %13, %cst_18 [1] : vector<8x8xf32> to vector<8xf32>
    %15 = vector.shape_cast %14 : vector<8xf32> to vector<8x1xf32>
    %16 = vector.broadcast %15 : vector<8x1xf32> to vector<8x8xf32>
    %17 = arith.subf %13, %16 : vector<8x8xf32>
    %18 = math.exp %17 : vector<8x8xf32>
    %cst_19 = arith.constant dense<0.000000e+00> : vector<8xf32>
    %19 = vector.multi_reduction <add>, %18, %cst_19 [1] : vector<8x8xf32> to vector<8xf32>
    %20 = vector.shape_cast %19 : vector<8xf32> to vector<8x1xf32>
    %21 = tpu.reciprocal %20 : vector<8x1xf32> -> vector<8x1xf32>
    %22 = vector.broadcast %21 : vector<8x1xf32> to vector<8x8xf32>
    %23 = arith.mulf %18, %22 : vector<8x8xf32>
    %cst_20 = arith.constant dense<0.000000e+00> : vector<8x32xf32>
    %24 = tpu.matmul %23, %5, %cst_20 {dimension_numbers = #tpu.dot_dimension_numbers<[1], [0], [0], [1], [0, 0, 1, 1], [], []>} : vector<8x8xf32>, vector<8x32xf32>, vector<8x32xf32> -> vector<8x32xf32>
    %c0_21 = arith.constant 0 : index
    %c0_22 = arith.constant 0 : index
    %c0_23 = arith.constant 0 : index
    %c0_24 = arith.constant 0 : index
    %25 = vector.load %arg7[%c0_21, %c0_22, %c0_23, %c0_24] : memref<1x1x8x32xf32, #tpu.memory_space<vmem>>, vector<1x1x8x32xf32>
    %26 = vector.shape_cast %25 : vector<1x1x8x32xf32> to vector<8x32xf32>
    %27 = vector.shape_cast %24 : vector<8x32xf32> to vector<1x1x8x32xf32>
    tpu.vector_store %arg7[%c0_21, %c0_22, %c0_23, %c0_24], %27 {strides = array<i32>} : memref<1x1x8x32xf32, #tpu.memory_space<vmem>>, vector<1x1x8x32xf32>,
    %c0_25 = arith.constant 0 : index
    %c0_26 = arith.constant 0 : index
    %c0_27 = arith.constant 0 : index
    %c0_28 = arith.constant 0 : index
    %28 = vector.load %arg8[%c0_25, %c0_26, %c0_27, %c0_28] : memref<1x1x8x8xf32, #tpu.memory_space<vmem>>, vector<1x1x8x8xf32>
    %29 = vector.shape_cast %28 : vector<1x1x8x8xf32> to vector<8x8xf32>
    %30 = vector.shape_cast %23 : vector<8x8xf32> to vector<1x1x8x8xf32>
    tpu.vector_store %arg8[%c0_25, %c0_26, %c0_27, %c0_28], %30 {strides = array<i32>} : memref<1x1x8x8xf32, #tpu.memory_space<vmem>>, vector<1x1x8x8xf32>,
    return
  }
  func.func @transform_0(%arg0: i32, %arg1: i32, %arg2: i32) -> (i32, i32, i32, i32) {
    %c0_i32 = arith.constant 0 : i32
    %c0_i32_0 = arith.constant 0 : i32
    return %arg0, %arg1, %arg2, %c0_i32 : i32, i32, i32, i32
  }
  func.func @transform_1(%arg0: i32, %arg1: i32, %arg2: i32) -> (i32, i32, i32, i32) {
    %c0_i32 = arith.constant 0 : i32
    %c0_i32_0 = arith.constant 0 : i32
    %c0_i32_1 = arith.constant 0 : i32
    return %arg0, %arg1, %c0_i32, %c0_i32_0 : i32, i32, i32, i32
  }
  func.func @transform_2(%arg0: i32, %arg1: i32, %arg2: i32) -> (i32, i32, i32, i32) {
    %c0_i32 = arith.constant 0 : i32
    %c0_i32_0 = arith.constant 0 : i32
    %c0_i32_1 = arith.constant 0 : i32
    return %arg0, %arg1, %c0_i32, %c0_i32_0 : i32, i32, i32, i32
  }
  func.func @transform_3(%arg0: i32, %arg1: i32, %arg2: i32) -> (i32, i32, i32, i32) {
    %c0_i32 = arith.constant 0 : i32
    %c0_i32_0 = arith.constant 0 : i32
    return %arg0, %arg1, %arg2, %c0_i32 : i32, i32, i32, i32
  }
  func.func @transform_4(%arg0: i32, %arg1: i32, %arg2: i32) -> (i32, i32, i32, i32) {
    %c0_i32 = arith.constant 0 : i32
    %c0_i32_0 = arith.constant 0 : i32
    return %arg0, %arg1, %arg2, %c0_i32 : i32, i32, i32, i32
  }
  func.func @transform_5(%arg0: i32, %arg1: i32, %arg2: i32) -> (i32, i32, i32, i32) {
    %c0_i32 = arith.constant 0 : i32
    %c0_i32_0 = arith.constant 0 : i32
    return %arg0, %arg1, %arg2, %c0_i32 : i32, i32, i32, i32
  }
}

</mosaic_0001>

<bundles_post_ra>
// kernel: tpu_custom_call.1
= control target key start
LH: loop header
LB: loop body
LE: loop exit
PB: predicated region body
PF: predicated region fallthrough
CT: control target
= control target key end

     0   :  { %s1276_s0 = inlined_call_operand.vmem [shape: f32[2,2,8,32], index: 0, kind: input, shape index: {}]   ;;  %s1277_s1 = inlined_call_operand.hbm [shape: f32[2,2,8,32], index: 1, kind: input, shape index: {}]   ;;  %s1278_s2 = inlined_call_operand.hbm [shape: f32[2,2,8,32], index: 2, kind: input, shape index: {}]   ;;  %s1279_s3 = inlined_call_operand.vmem [shape: s32[2,2,8,8], index: 3, kind: input, shape index: {}]   ;;  %s1280_s4 = inlined_call_operand.hbm [shape: f32[2,2,8,32], index: 4, kind: output, shape index: {0}]   ;;  %s1281_s5 = inlined_call_operand.hbm [shape: f32[2,2,8,8], index: 5, kind: output, shape index: {1}]  }
   0x1   :  { %1285 = sst [smem:[#allocation17_spill]] %s1277_s1 }
   0x2   :  { %11 = vsyncpa [#allocation3], 0 }
   0x3   :  { %13 = vsyncpa [#allocation3 + $0x1], 0 }
   0x4   :  { %14 = vsyncpa [#allocation6], 0 }
   0x5   :  { %16 = vsyncpa [#allocation6 + $0x1], 0 }
   0x6   :  { %17 = vsyncpa [#allocation4], 0 }
   0x7   :  { %19 = vsyncpa [#allocation4 + $0x1], 0 }
   0x8   :  { %20 = vsyncpa [#allocation9], 0 }
   0x9   :  { %22 = vsyncpa [#allocation9 + $0x1], 0  ;;  %s1076_s18 = smov 0   ;;  %s1078_s19 = smov 0  }
   0xa   :  { %s1080_s20 = smov 0   ;;  %s1082_s21 = smov 0  }
   0xb   :  { %s1084_s22 = smov 0   ;;  %s1086_s23 = smov 0  }
   0xc   :  { %s1088_s24 = smov 0   ;;  %s1090_s25 = smov 0  }
   0xd LB: > { %1286 = sst [smem:[#allocation14_spill]] %s1040_s24  ;;  %s728_s26 = sadd.s32 4294967295, %s1044_s25   ;;  %s1044_s25 = sphi %s1090_s25, %s28_s25   ;;  %s1040_s24 = sphi %s1088_s24, %s1297_s24   ;;  %s1036_s23 = sphi %s1086_s23, %s1302_s23   ;;  %s1032_s22 = sphi %s1084_s22, %s1295_s22   ;;  %s1028_s21 = sphi %s1082_s21, %s1301_s21   ;;  %s1024_s20 = sphi %s1080_s20, %s1300_s20   ;;  %s1020_s19 = sphi %s1078_s19, %s1299_s19   ;;  %s1016_s18 = sphi %s1076_s18, %s1298_s18  }
   0xe   : > { %s729_s27 = sadd.s32 4294967294, %s1044_s25   ;;  %s43_s28 = sadd.s32 1, %s1036_s23 }
   0xf   : > { %s47_s29 = sadd.s32 1, %s1040_s24  ;;  %p45_p0 = scmp.ge.s32.totalorder %s43_s28, 2 }
  0x10   : > { %s86_s30 = sadd.s32 1, %s1024_s20  ;;  %p93_p1 = scmp.ne.s32.totalorder %s1024_s20, %s1020_s19 }
  0x11   : > { %p94_p2 = scmp.eq.s32.totalorder %s1044_s25, 0  ;;  %s1304_s28 = smov (%p45_p0, %s43_s28), 0 }
  0x12   : > { %1287 = sst [smem:[#allocation15_spill]] %s1304_s28  ;;  %s1306_s29 = smov (!%p45_p0, %s47_s29), %s1040_s24 }
  0x13   : > { %s82_s6 = ssub.s32 %s1036_s23, %s1304_s28  ;;  %p1129_p3 = por %p94_p2, %p93_p1 }
  0x14   : > { %p49_p4 = scmp.ge.s32.totalorder %s1306_s29, 2  ;;  %p99_p5 = scmp.ne.s32.totalorder %s1020_s19, %s1016_s18 }
  0x15   : > { %p100_p6 = scmp.eq.s32.totalorder %s728_s26, 0  ;;  %p185_p7 = scmp.eq.s32.totalorder %s728_s26, 3 }
  0x16   : > { %s1308_s29 = smov (%p49_p4, %s1306_s29), 0  ;;  %p191_p10 = scmp.eq.s32.totalorder %s729_s27, 3 }
  0x17   : > { %1289 = sst [smem:[#allocation16_spill]] %s1308_s29  ;;  %p1137_p8 = por %p100_p6, %p99_p5 }
  0x18   : > { %p1141_p9 = por %p185_p7, %p93_p1  ;;  %s81_s10 = ssub.s32 %s1040_s24, %s1308_s29 }
  0x19   : > { %s83_s11 = sor.u32 %s82_s6, %s81_s10  ;;  %p1147_p12 = por %p191_p10, %p99_p5 }
  0x1a   : > { %p84_p11 = scmp.eq.s32.totalorder %s83_s11, 0  ;;  %p780_p13 = scmp.lt.s32.totalorder %s1044_s25, 4 }
  0x1b   : > { %s255_s13 = sand.u32 1, %s1024_s20   ;;  %s733_s16 = sshll.u32 %s1040_s24, 1 }
  0x1c   : > { %s1154_s14 = scalar_select %p84_p11, %s1024_s20, %s86_s30  }
  0x1d   : > { %s732_s15 = sshll.u32 %s255_s13, 3  ;;  %s263_s17 = sadd.s32 %s1036_s23, %s733_s16 }
  0x1e   : > { %s259_s26 = scalar_lea.vmem [#allocation2], %s732_s15  ;;  %s734_s29 = sshll.u32 %s263_s17, 3 }
  0x1f   : > { %s269_s28 = sshll.u32 %s259_s26, 4  ;;  %s1293_s1 = sld [smem:[#allocation17_spill]]  ;;  %s270_s28 = int_to_ptr.vmem [resolvable:$true] %s269_s28 }
  0x20   : > { %p1163_p0 = pnand %p780_p13, %p1129_p3  ;;  %p738_p1 = scmp.ge.s32.totalorder %s1044_s25, 1 }
  0x21   : > { %s256_s24 = scalar_lea.sflag [#allocation3], %s255_s13  ;;  %p309_p2 = scmp.lt.s32.totalorder %s1044_s25, 5 }
  0x22   : > { %s286_s26 = scalar_lea.hbm %s1278_s2, %s734_s29  ;;  %s280_s7 = scalar_lea.vmem [#allocation5], %s732_s15 }
  0x23   : > { %p310_p4 = pnand %p738_p1, %p309_p2  ;;  %s288_s27 = sshll.u32 %s286_s26, 4  ;;  %s289_s27 = int_to_ptr.hbm [resolvable:$true] %s288_s27 }
  0x24   : > { %s290_s6 = sshll.u32 %s280_s7, 4  ;;  %s291_s6 = int_to_ptr.vmem [resolvable:$true] %s290_s6 }
  0x25   : > { %s265_s10 = scalar_lea.hbm %s1293_s1, %s734_s29  ;;  %s277_s1 = scalar_lea.sflag [#allocation6], %s255_s13 }
  0x26   : > { %s267_s30 = sshll.u32 %s265_s10, 4  ;;  %313 = sbr.rel (%p310_p4) target bundleno = 578 (0x242), region = 36  ;;  %s268_s30 = int_to_ptr.hbm [resolvable:$true] %s267_s30 }
  0x27   : > { %769 = dma.hbm_to_vmem [thread:$0]  (!%p1163_p0), %s268_s30, 128, %s270_s28, %s256_s24  }
  0x28   : > { %772 = dma.hbm_to_vmem [thread:$0]  (!%p1163_p0), %s289_s27, 128, %s291_s6, %s277_s1  }
  0x29   : > { %s1177_s10 = sand.u32 (!%p310_p4), 1, %s1020_s19  }
  0x2a   : > { %s1180_s24 = sshll.u32 (!%p310_p4), %s1177_s10, 3  ;;  %s316_s28 = scalar_lea.sflag (!%p310_p4), [#allocation3], %s1177_s10 }
  0x2b   : > { %s319_s29 = scalar_lea.vmem [#allocation2], %s1180_s24 }
  0x2c   : > { %999 = dma.done.wait (%p1137_p8), %s316_s28, 128  }
  0x2d   : > { %1001 = vsyncadd (%p1137_p8), %s316_s28, 4294967168  ;;  %s326_s1 = scalar_lea.sflag [#allocation6], %s1177_s10  ;;  %s329_s13 = scalar_lea.vmem [#allocation5], %s1180_s24 }
  0x2e   : > { %1003 = dma.done.wait (%p1137_p8), %s326_s1, 128  }
  0x2f   : > { %1005 = vsyncadd (%p1137_p8), %s326_s1, 4294967168  ;;  %p389_p3 = scmp.lt.s32.totalorder %s1032_s22, 1  ;;  %p391_p5 = scmp.lt.s32.totalorder %s1028_s21, 1  ;;  %vm417_vm0 = vcmask 261120   ;;  %v412_v0 = vld [vmem:[%s319_s29] sm:$0xff]  ;;  %vm445_vm2 = vcmask 64512  }
  0x30   : > { %747 = vmatpush.xpose.msk.msra.mxu0 %vm417_vm0, %v412_v0  ;;  %v413_v12 = vld [vmem:[%s329_s13] sm:$0xff]  ;;  %s752_s29 = sshll.u32 %s1032_s22, 1  ;;  %s930_s6 = scalar_lea.hbm %s1281_s5, 32 }
  0x31   : > { %s390_s15 = scalar_select %p389_p3, %s1032_s22, 1  ;;  %488 = vmatpush.msra.mxu1 %v413_v12 }
  0x32   : > { %s392_s11 = scalar_select %p391_p5, %s1028_s21, 1 }
  0x33   : > { %s743_s30 = sshll.u32 %s390_s15, 1  ;;  %s1212_s1 = sadd.s32 %s1028_s21, %s752_s29 }
  0x34   : > { %s397_s16 = sadd.s32 %s743_s30, %s392_s11  ;;  %s753_s13 = sshll.u32 %s1212_s1, 3 }
  0x35   : > { %s744_s17 = sshll.u32 %s397_s16, 3  ;;  %s531_s30 = scalar_lea.hbm %s1281_s5, %s753_s13 }
  0x36   : > { %s399_s7 = scalar_lea.vmem %s1276_s0, %s744_s17  ;;  %s410_s28 = scalar_lea.vmem %s1279_s3, %s744_s17 }
  0x37   : > { %v411_v1 = vld [vmem:[%s399_s7] sm:$0xff]  ;;  %s388_s22 = scalar_lea.vmem [#allocation8], %s1180_s24  ;;  %s535_s16 = sshll.u32 %s531_s30, 4  ;;  %s536_s16 = int_to_ptr.hbm [resolvable:$true] %s535_s16 }
  0x38   : > { %v416_v2 = vmul.f32 0.17677669, %v411_v1  ;;  %v414_v3 = vld [vmem:[%s410_s28] sm:$0xff]  ;;  %s533_s21 = sshll.u32 %s388_s22, 4  ;;  %s501_s17 = scalar_lea.sflag [#allocation9], %s1177_s10  ;;  %s534_s21 = int_to_ptr.vmem [resolvable:$true] %s533_s21 }
  0x39   : > { %vm415_vm1 = vcmp.ne.s32.totalorder %v414_v3, 0  ;;  %s924_s26 = sshra.s32 %s536_s16, 4  ;;  %s925_s26 = int_to_ptr.hbm [resolvable:$true] %s924_s26 }
  0x3a   : > { %748 = vmatmul.msk.f32.vlgmr.msra.gmra.mxu0 %vm417_vm0, %v416_v2  ;;  %s926_s27 = scalar_lea.hbm %s925_s26, 8  ;;  %p931_p10 = scmp.lt.s32.totalorder %s925_s26, %s1281_s5 }
  0x3b   : > { %p927_p6 = scmp.ne.s32.totalorder %s925_s26, %s926_s27  ;;  %p932_p11 = scmp.lt.s32.totalorder %s930_s6, %s926_s27 }
  0x3d   : > { %p928_p7 = pnand %p927_p6, %p1141_p9  ;;  %p933_p13 = por %p932_p11, %p931_p10 }
  0x3f   : > { %p929_p8 = pneg %p928_p7 }
  0x41   : > { %p934_p0 = pnand %p933_p13, %p929_p8 }
  0xb7   : > { %v441_v4 = vpop.f32.mrf.mxu0 }
  0xb8   : > { %v444_v5 = vsel %vm415_vm1, -1e+09, %v441_v4 }
  0xb9   : > { %v446_v6 = vsel %vm445_vm2, %v444_v5, -inf }
  0xba   : > { %447 = vmax.xlane.f32.xlu0 %v446_v6 }
 0x12d   : > { %v448_v7 = vpop.xlane.xlu0 %447 }
 0x12e   : > { %v449_v8 = vsub.f32 %v444_v5, %v448_v7 }
 0x130   : > { %v450_v9 = vmul.f32 1.442695, %v449_v8 }
 0x132   : > { %846 = vpow2.f32 %v450_v9 }
 0x138   : > { %v847_v10 = vpop.eup %846 }
 0x139   : > { %v452_v11 = vsel %vm445_vm2, %v847_v10, 0.0 }
 0x13a   : > { %453 = vadd.xlane.f32.xlu0 %v452_v11 }
 0x1ad   : > { %v454_v13 = vpop.xlane.xlu0 %453 }
 0x1ae   : > { %848 = vrcp.f32 %v454_v13  ;;  %v466_v17 = vand.u32 2147483648, %v454_v13  ;;  %v464_v19 = vand.u32 2147483647, %v454_v13  ;;  %vm460_vm4 = vweird.f32 %v454_v13 }
 0x1b0   : > { %v467_v21 = vor.u32 1.1754944e-38, %v466_v17  ;;  %vm465_vm6 = vcmp.eq.f32.partialorder %v464_v19, 8.507059e+37 }
 0x1b4   : > { %v849_v14 = vpop.eup %848 }
 0x1b5   : > { %v456_v15 = vmul.f32 %v849_v14, %v454_v13  ;;  %vm461_vm3 = vweird.f32 %v849_v14 }
 0x1b6   : > { %vm462_vm5 = vmor %vm460_vm4, %vm461_vm3 }
 0x1b7   : > { %v457_v16 = vsub.f32 1.0, %v456_v15 }
 0x1b9   : > { %v458_v18 = vmul.f32 %v849_v14, %v457_v16 }
 0x1bb   : > { %v459_v20 = vadd.f32 %v849_v14, %v458_v18 }
 0x1bd   : > { %v463_v22 = vsel %vm462_vm5, %v849_v14, %v459_v20 }
 0x1be   : > { %v468_v23 = vsel %vm465_vm6, %v467_v21, %v463_v22 }
 0x1bf   : > { %v469_v24 = vmul.f32 %v847_v10, %v468_v23 }
 0x1c1   : > { %749 = vmatmul.msk.f32.vlgmr.msra.gmra.mxu1 %vm445_vm2, %v469_v24  ;;  %494 = vst.msk [vmem:[%s388_s22] sm:$0xff] %vm445_vm2, %v469_v24 }
 0x1c2   : > { %937 = shalt.err (!%p934_p0)
}
 0x1c3   : > { %763 = dma.vmem_to_hbm [thread:$0]  (%p1141_p9), %s534_s21, 128, %s536_s16, %s501_s17  }
 0x1c4   : > { %s514_s11 = scalar_lea.hbm %s1280_s4, %s753_s13  ;;  %s381_s30 = scalar_lea.vmem [#allocation7], %s1180_s24 }
 0x1c5   : > { %s516_s22 = sshll.u32 %s381_s30, 4  ;;  %s518_s7 = sshll.u32 %s514_s11, 4  ;;  %s517_s22 = int_to_ptr.vmem [resolvable:$true] %s516_s22  ;;  %s519_s7 = int_to_ptr.hbm [resolvable:$true] %s518_s7 }
 0x1c6   : > { %s496_s26 = scalar_lea.sflag [#allocation4], %s1177_s10  ;;  %s952_s27 = sshra.s32 %s519_s7, 4  ;;  %s953_s27 = int_to_ptr.hbm [resolvable:$true] %s952_s27 }
 0x1c7   : > { %s954_s8 = scalar_lea.hbm %s953_s27, 8  ;;  %s958_s13 = scalar_lea.hbm %s1280_s4, 32 }
 0x1c8   : > { %p955_p1 = scmp.ne.s32.totalorder %s953_s27, %s954_s8  ;;  %p959_p3 = scmp.lt.s32.totalorder %s953_s27, %s1280_s4 }
 0x1c9   : > { %p960_p5 = scmp.lt.s32.totalorder %s958_s13, %s954_s8 }
 0x1ca   : > { %p956_p2 = pnand %p955_p1, %p1141_p9 }
 0x1cb   : > { %p961_p6 = por %p960_p5, %p959_p3 }
 0x1cc   : > { %p957_p4 = pneg %p956_p2 }
 0x1ce   : > { %p962_p7 = pnand %p961_p6, %p957_p4 }
 0x23e   : > { %v490_v25 = vpop.f32.mrf.mxu1 }
 0x23f   : > { %493 = vst.msk [vmem:[%s381_s30] sm:$0xff] %vm417_vm0, %v490_v25 }
 0x240   : > { %965 = shalt.err (!%p962_p7)
}
 0x241   : > { %762 = dma.vmem_to_hbm [thread:$0]  (%p1141_p9), %s517_s22, 128, %s519_s7, %s496_s26  }
 0x242 PF: > { %p781_p8 = scmp.ge.s32.totalorder %s1044_s25, 2  ;;  %s547_s10 = sand.u32 1, %s1016_s18  }
 0x243   : > { %s548_s6 = scalar_lea.sflag [#allocation4], %s547_s10 }
 0x244   : > { %p774_p10 = pnand %p781_p8, %p1147_p12 }
 0x246   : > { %p775_p11 = pneg %p774_p10 }
 0x248   : > { %1007 = dma.done.wait (%p775_p11), %s548_s6, 128  }
 0x249   : > { %1009 = vsyncadd (%p775_p11), %s548_s6, 4294967168  ;;  %s558_s28 = scalar_lea.sflag [#allocation9], %s547_s10 }
 0x24a   : > { %1011 = dma.done.wait (%p775_p11), %s558_s28, 128  }
 0x24b   : > { %1013 = vsyncadd (%p775_p11), %s558_s28, 4294967168  ;;  %s28_s25 = sadd.s32 1, %s1044_s25   ;;  %s1295_s22 = sld [smem:[#allocation14_spill]] }
 0x24c   : > { %p25_p13 = scmp.ge.s32.totalorder %s28_s25, 6   ;;  %s1296_s9 = sld [smem:[#allocation15_spill]] }
 0x24d   : > { %s1297_s24 = sld [smem:[#allocation16_spill]]  ;;  %s1298_s18 = smov %s1020_s19 }
 0x24e   : > { %s1299_s19 = smov %s1024_s20  ;;  %s1300_s20 = smov %s1154_s14 }
 0x24f   : > { %s1301_s21 = smov %s1036_s23  ;;  %27 = sbr.rel (!%p25_p13) target bundleno = 13 (0xd), region = 117 }
 0x252   : > { %s1302_s23 = smov %s1296_s9 }
 0x254   :  { %564 = vsyncpa [#allocation3], 1 }
 0x255   :  { %566 = vsyncpa [#allocation3 + $0x1], 1 }
 0x256   :  { %567 = vsyncpa [#allocation6], 1 }
 0x257   :  { %569 = vsyncpa [#allocation6 + $0x1], 1 }
 0x258   :  { %570 = vsyncpa [#allocation4], 1 }
 0x259   :  { %572 = vsyncpa [#allocation4 + $0x1], 1 }
 0x25a   :  { %573 = vsyncpa [#allocation9], 1 }
 0x25b   :  { %575 = vsyncpa [#allocation9 + $0x1], 1 }

</bundles_post_ra>
